<compile_context>
chip_gen: v5e
topology: v5e:2x2
jax: 0.10.0
libtpu: 0.0.40
codegen_flags: <defaults>
</compile_context>

<pallas_src>
import functools

import jax
import jax.numpy as jnp
from jax.experimental import pallas as pl
from jax.experimental.pallas import tpu as pltpu

LANES = 128
MIN_BLOCK_ROWS = 256  # ~0.35us fixed cost per grid step -> keep tiles big.


def _cdiv(a, b):
    return -(-a // b)


def _round_up(a, m):
    return _cdiv(a, m) * m


def net2_kernel(w1_ref, b1_ref, w2_ref, b2_ref, x_ref, o_ref, *, hidden):
    # x tile: (block_rows, 128) f32, batch lane-dense.
    x = x_ref[...]
    # Fold the output bias and hidden unit 0 into the accumulator init
    # (drops the zeros init and the final `+ b2` vector op).
    acc = jnp.maximum(x * w1_ref[0] + b1_ref[0], 0.0) * w2_ref[0] + b2_ref[0]
    # Unrolled VPU loop over the remaining hidden units.  Each SMEM scalar is
    # used exactly once, so it lowers to a vector-scalar VALU operand rather
    # than re-materialized per-vreg broadcasts inside the tile loop.
    for j in range(1, hidden):
        acc = acc + jnp.maximum(x * w1_ref[j] + b1_ref[j], 0.0) * w2_ref[j]
    o_ref[...] = acc


def _pick_block_rows(rows, requested):
    """Choose the per-step row-tile size (multiple of 8)."""
    rows8 = _round_up(rows, 8)
    # Honor the caller's cap but never allow tiny streamed tiles.
    req = _round_up(max(MIN_BLOCK_ROWS, int(requested)), 8)
    br = min(req, rows8)  # never exceed the data
    # If halving still leaves decent tiles, cap at ~rows/2 so grid_n >= 2 and
    # the "parallel" batch axis can be sharded across v7x's two TensorCores.
    half = _round_up(_cdiv(rows8, 2), 8)
    if half >= MIN_BLOCK_ROWS:
        br = min(br, half)
    return max(br, 8)


def net2_forward(x, w1, b1, w2, b2, *, block_rows=2048):
    """x: (N, 1) f32; w1: (1, H); b1: (1, H); w2: (H, 1); b2: (1, 1)."""
    n = x.shape[0]
    hidden = w1.shape[-1]

    rows = max(1, _cdiv(n, LANES))
    ragged = n != rows * LANES

    flat = x.reshape(-1).astype(jnp.float32)
    if ragged:
        # Small tail pad (< 128 elements) only; padded elements compute garbage
        # that is dropped by the final slice.
        flat = jnp.pad(flat, (0, rows * LANES - n))
    # Fast path (N % 128 == 0): pure row-major reshape, no extra HBM copy.
    x2d = flat.reshape(rows, LANES)

    br = _pick_block_rows(rows, block_rows)
    grid_n = _cdiv(rows, br)

    # Tiny params live whole in SMEM: one cheap transfer, resident across steps.
    w1f = w1.reshape(hidden).astype(jnp.float32)
    b1f = b1.reshape(hidden).astype(jnp.float32)
    w2f = w2.reshape(hidden).astype(jnp.float32)
    b2f = b2.reshape(1).astype(jnp.float32)

    kernel = functools.partial(net2_kernel, hidden=hidden)
    smem_spec = pl.BlockSpec(memory_space=pltpu.MemorySpace.SMEM)

    out2d = pl.pallas_call(
        kernel,
        out_shape=jax.ShapeDtypeStruct((rows, LANES), jnp.float32),
        grid=(grid_n,),
        in_specs=[
            smem_spec,  # w1 (H,)
            smem_spec,  # b1 (H,)
            smem_spec,  # w2 (H,)
            smem_spec,  # b2 (1,)
            # x tile; ragged last block is masked by Pallas (reads padded,
            # out-of-bounds writes dropped), so no wrapper-side block padding.
            pl.BlockSpec((br, LANES), lambda i: (i, 0)),
        ],
        out_specs=pl.BlockSpec((br, LANES), lambda i: (i, 0)),
        compiler_params=pltpu.CompilerParams(
            dimension_semantics=("parallel",),  # batch rows independent (v7x TCs)
        ),
        cost_estimate=pl.CostEstimate(
            flops=5 * hidden * rows * LANES,
            transcendentals=0,
            bytes_accessed=2 * 4 * rows * LANES + 4 * (3 * hidden + 1),
        ),
    )(w1f, b1f, w2f, b2f, x2d)

    if ragged:
        return out2d.reshape(-1)[:n].reshape(n, 1)
    return out2d.reshape(n, 1)  # free reshape, no copy


def init_params(key, in_features=1, hidden=20, out_features=1):
    # Mimics nn.Linear's U(-1/sqrt(fan_in), 1/sqrt(fan_in)) init, stored so that
    # y = x @ W + b matches PyTorch's x @ W.T + b.
    k1, k2, k3, k4 = jax.random.split(key, 4)
    bound1 = 1.0 / jnp.sqrt(in_features)
    bound2 = 1.0 / jnp.sqrt(hidden)
    w1 = jax.random.uniform(k1, (in_features, hidden), jnp.float32, -bound1, bound1)
    b1 = jax.random.uniform(k2, (1, hidden), jnp.float32, -bound1, bound1)
    w2 = jax.random.uniform(k3, (hidden, out_features), jnp.float32, -bound2, bound2)
    b2 = jax.random.uniform(k4, (1, out_features), jnp.float32, -bound2, bound2)
    return w1, b1, w2, b2


def _ref(x, w1, b1, w2, b2):
    return jnp.maximum(x @ w1 + b1, 0.0) @ w2 + b2


if __name__ == "__main__":
    key = jax.random.PRNGKey(0)
    k1, k2, k3, k4, kp = jax.random.split(key, 5)
    w1, b1, w2, b2 = init_params(kp)

    # 1) Tiny batch, in_features=1 as the module's forward implies (ragged path).
    N = 8
    x = jax.random.normal(k1, (N, 1), jnp.float32)
    y = jax.block_until_ready(net2_forward(x, w1, b1, w2, b2))
    assert y.shape == (N, 1)
    assert jnp.allclose(y, _ref(x, w1, b1, w2, b2), atol=1e-5, rtol=1e-5)

    # 2) Ragged batch with a caller-requested tiny tile -> clamped to one full tile.
    N2 = 3000
    x2 = jax.random.normal(k2, (N2, 1), jnp.float32)
    y2 = jax.block_until_ready(net2_forward(x2, w1, b1, w2, b2, block_rows=8))
    assert y2.shape == (N2, 1)
    assert jnp.allclose(y2, _ref(x2, w1, b1, w2, b2), atol=1e-5, rtol=1e-5)

    # 3) N % 128 == 0 fast path: copy-free reshapes on both sides.
    N3 = 1024
    x3 = jax.random.normal(k3, (N3, 1), jnp.float32)
    y3 = jax.block_until_ready(net2_forward(x3, w1, b1, w2, b2))
    assert y3.shape == (N3, 1)
    assert jnp.allclose(y3, _ref(x3, w1, b1, w2, b2), atol=1e-5, rtol=1e-5)

    # 4) Larger ragged batch: grid_n == 2 (streamed, double-buffered tiles with a
    #    masked ragged edge on the last block).
    N4 = 70000
    x4 = jax.random.normal(k4, (N4, 1), jnp.float32)
    y4 = jax.block_until_ready(net2_forward(x4, w1, b1, w2, b2))
    assert y4.shape == (N4, 1)
    assert jnp.allclose(y4, _ref(x4, w1, b1, w2, b2), atol=1e-5, rtol=1e-5)

    print("KERNEL_OK")
</pallas_src>

<mosaic_0001>
module attributes {stable_mosaic.version = 11 : i64} {
  func.func @net2_kernel(%arg0: i32, %arg1: memref<20xf32, #tpu.memory_space<smem>>, %arg2: memref<20xf32, #tpu.memory_space<smem>>, %arg3: memref<20xf32, #tpu.memory_space<smem>>, %arg4: memref<1xf32, #tpu.memory_space<smem>>, %arg5: memref<8x128xf32, #tpu.memory_space<vmem>>, %arg6: memref<8x128xf32, #tpu.memory_space<vmem>>) attributes {dimension_semantics = [#tpu.dimension_semantics<parallel>], iteration_bounds = array<i64: 1>, scalar_prefetch = 0 : i64, scratch_operands = 0 : i64, tpu.core_type = #tpu.core_type<tc>, window_params = [{transform_indices = @transform_0, window_bounds = array<i64: 20>}, {transform_indices = @transform_1, window_bounds = array<i64: 20>}, {transform_indices = @transform_2, window_bounds = array<i64: 20>}, {transform_indices = @transform_3, window_bounds = array<i64: 1>}, {transform_indices = @transform_4, window_bounds = array<i64: 8, 128>}, {transform_indices = @transform_5, window_bounds = array<i64: 8, 128>}]} {
    %c0 = arith.constant 0 : index
    %c0_0 = arith.constant 0 : index
    %0 = vector.load %arg5[%c0, %c0_0] : memref<8x128xf32, #tpu.memory_space<vmem>>, vector<8x128xf32>
    %c0_1 = arith.constant 0 : index
    %1 = memref.load %arg1[%c0_1] : memref<20xf32, #tpu.memory_space<smem>>
    %2 = vector.broadcast %1 : f32 to vector<8x128xf32>
    %3 = arith.mulf %0, %2 : vector<8x128xf32>
    %c0_2 = arith.constant 0 : index
    %4 = memref.load %arg2[%c0_2] : memref<20xf32, #tpu.memory_space<smem>>
    %5 = vector.broadcast %4 : f32 to vector<8x128xf32>
    %6 = arith.addf %3, %5 : vector<8x128xf32>
    %cst = arith.constant 0.000000e+00 : f32
    %7 = vector.broadcast %cst : f32 to vector<8x128xf32>
    %8 = arith.maximumf %6, %7 : vector<8x128xf32>
    %c0_3 = arith.constant 0 : index
    %9 = memref.load %arg3[%c0_3] : memref<20xf32, #tpu.memory_space<smem>>
    %10 = vector.broadcast %9 : f32 to vector<8x128xf32>
    %11 = arith.mulf %8, %10 : vector<8x128xf32>
    %c0_4 = arith.constant 0 : index
    %12 = memref.load %arg4[%c0_4] : memref<1xf32, #tpu.memory_space<smem>>
    %13 = vector.broadcast %12 : f32 to vector<8x128xf32>
    %14 = arith.addf %11, %13 : vector<8x128xf32>
    %c1 = arith.constant 1 : index
    %15 = memref.load %arg1[%c1] : memref<20xf32, #tpu.memory_space<smem>>
    %16 = vector.broadcast %15 : f32 to vector<8x128xf32>
    %17 = arith.mulf %0, %16 : vector<8x128xf32>
    %c1_5 = arith.constant 1 : index
    %18 = memref.load %arg2[%c1_5] : memref<20xf32, #tpu.memory_space<smem>>
    %19 = vector.broadcast %18 : f32 to vector<8x128xf32>
    %20 = arith.addf %17, %19 : vector<8x128xf32>
    %cst_6 = arith.constant 0.000000e+00 : f32
    %21 = vector.broadcast %cst_6 : f32 to vector<8x128xf32>
    %22 = arith.maximumf %20, %21 : vector<8x128xf32>
    %c1_7 = arith.constant 1 : index
    %23 = memref.load %arg3[%c1_7] : memref<20xf32, #tpu.memory_space<smem>>
    %24 = vector.broadcast %23 : f32 to vector<8x128xf32>
    %25 = arith.mulf %22, %24 : vector<8x128xf32>
    %26 = arith.addf %14, %25 : vector<8x128xf32>
    %c2 = arith.constant 2 : index
    %27 = memref.load %arg1[%c2] : memref<20xf32, #tpu.memory_space<smem>>
    %28 = vector.broadcast %27 : f32 to vector<8x128xf32>
    %29 = arith.mulf %0, %28 : vector<8x128xf32>
    %c2_8 = arith.constant 2 : index
    %30 = memref.load %arg2[%c2_8] : memref<20xf32, #tpu.memory_space<smem>>
    %31 = vector.broadcast %30 : f32 to vector<8x128xf32>
    %32 = arith.addf %29, %31 : vector<8x128xf32>
    %cst_9 = arith.constant 0.000000e+00 : f32
    %33 = vector.broadcast %cst_9 : f32 to vector<8x128xf32>
    %34 = arith.maximumf %32, %33 : vector<8x128xf32>
    %c2_10 = arith.constant 2 : index
    %35 = memref.load %arg3[%c2_10] : memref<20xf32, #tpu.memory_space<smem>>
    %36 = vector.broadcast %35 : f32 to vector<8x128xf32>
    %37 = arith.mulf %34, %36 : vector<8x128xf32>
    %38 = arith.addf %26, %37 : vector<8x128xf32>
    %c3 = arith.constant 3 : index
    %39 = memref.load %arg1[%c3] : memref<20xf32, #tpu.memory_space<smem>>
    %40 = vector.broadcast %39 : f32 to vector<8x128xf32>
    %41 = arith.mulf %0, %40 : vector<8x128xf32>
    %c3_11 = arith.constant 3 : index
    %42 = memref.load %arg2[%c3_11] : memref<20xf32, #tpu.memory_space<smem>>
    %43 = vector.broadcast %42 : f32 to vector<8x128xf32>
    %44 = arith.addf %41, %43 : vector<8x128xf32>
    %cst_12 = arith.constant 0.000000e+00 : f32
    %45 = vector.broadcast %cst_12 : f32 to vector<8x128xf32>
    %46 = arith.maximumf %44, %45 : vector<8x128xf32>
    %c3_13 = arith.constant 3 : index
    %47 = memref.load %arg3[%c3_13] : memref<20xf32, #tpu.memory_space<smem>>
    %48 = vector.broadcast %47 : f32 to vector<8x128xf32>
    %49 = arith.mulf %46, %48 : vector<8x128xf32>
    %50 = arith.addf %38, %49 : vector<8x128xf32>
    %c4 = arith.constant 4 : index
    %51 = memref.load %arg1[%c4] : memref<20xf32, #tpu.memory_space<smem>>
    %52 = vector.broadcast %51 : f32 to vector<8x128xf32>
    %53 = arith.mulf %0, %52 : vector<8x128xf32>
    %c4_14 = arith.constant 4 : index
    %54 = memref.load %arg2[%c4_14] : memref<20xf32, #tpu.memory_space<smem>>
    %55 = vector.broadcast %54 : f32 to vector<8x128xf32>
    %56 = arith.addf %53, %55 : vector<8x128xf32>
    %cst_15 = arith.constant 0.000000e+00 : f32
    %57 = vector.broadcast %cst_15 : f32 to vector<8x128xf32>
    %58 = arith.maximumf %56, %57 : vector<8x128xf32>
    %c4_16 = arith.constant 4 : index
    %59 = memref.load %arg3[%c4_16] : memref<20xf32, #tpu.memory_space<smem>>
    %60 = vector.broadcast %59 : f32 to vector<8x128xf32>
    %61 = arith.mulf %58, %60 : vector<8x128xf32>
    %62 = arith.addf %50, %61 : vector<8x128xf32>
    %c5 = arith.constant 5 : index
    %63 = memref.load %arg1[%c5] : memref<20xf32, #tpu.memory_space<smem>>
    %64 = vector.broadcast %63 : f32 to vector<8x128xf32>
    %65 = arith.mulf %0, %64 : vector<8x128xf32>
    %c5_17 = arith.constant 5 : index
    %66 = memref.load %arg2[%c5_17] : memref<20xf32, #tpu.memory_space<smem>>
    %67 = vector.broadcast %66 : f32 to vector<8x128xf32>
    %68 = arith.addf %65, %67 : vector<8x128xf32>
    %cst_18 = arith.constant 0.000000e+00 : f32
    %69 = vector.broadcast %cst_18 : f32 to vector<8x128xf32>
    %70 = arith.maximumf %68, %69 : vector<8x128xf32>
    %c5_19 = arith.constant 5 : index
    %71 = memref.load %arg3[%c5_19] : memref<20xf32, #tpu.memory_space<smem>>
    %72 = vector.broadcast %71 : f32 to vector<8x128xf32>
    %73 = arith.mulf %70, %72 : vector<8x128xf32>
    %74 = arith.addf %62, %73 : vector<8x128xf32>
    %c6 = arith.constant 6 : index
    %75 = memref.load %arg1[%c6] : memref<20xf32, #tpu.memory_space<smem>>
    %76 = vector.broadcast %75 : f32 to vector<8x128xf32>
    %77 = arith.mulf %0, %76 : vector<8x128xf32>
    %c6_20 = arith.constant 6 : index
    %78 = memref.load %arg2[%c6_20] : memref<20xf32, #tpu.memory_space<smem>>
    %79 = vector.broadcast %78 : f32 to vector<8x128xf32>
    %80 = arith.addf %77, %79 : vector<8x128xf32>
    %cst_21 = arith.constant 0.000000e+00 : f32
    %81 = vector.broadcast %cst_21 : f32 to vector<8x128xf32>
    %82 = arith.maximumf %80, %81 : vector<8x128xf32>
    %c6_22 = arith.constant 6 : index
    %83 = memref.load %arg3[%c6_22] : memref<20xf32, #tpu.memory_space<smem>>
    %84 = vector.broadcast %83 : f32 to vector<8x128xf32>
    %85 = arith.mulf %82, %84 : vector<8x128xf32>
    %86 = arith.addf %74, %85 : vector<8x128xf32>
    %c7 = arith.constant 7 : index
    %87 = memref.load %arg1[%c7] : memref<20xf32, #tpu.memory_space<smem>>
    %88 = vector.broadcast %87 : f32 to vector<8x128xf32>
    %89 = arith.mulf %0, %88 : vector<8x128xf32>
    %c7_23 = arith.constant 7 : index
    %90 = memref.load %arg2[%c7_23] : memref<20xf32, #tpu.memory_space<smem>>
    %91 = vector.broadcast %90 : f32 to vector<8x128xf32>
    %92 = arith.addf %89, %91 : vector<8x128xf32>
    %cst_24 = arith.constant 0.000000e+00 : f32
    %93 = vector.broadcast %cst_24 : f32 to vector<8x128xf32>
    %94 = arith.maximumf %92, %93 : vector<8x128xf32>
    %c7_25 = arith.constant 7 : index
    %95 = memref.load %arg3[%c7_25] : memref<20xf32, #tpu.memory_space<smem>>
    %96 = vector.broadcast %95 : f32 to vector<8x128xf32>
    %97 = arith.mulf %94, %96 : vector<8x128xf32>
    %98 = arith.addf %86, %97 : vector<8x128xf32>
    %c8 = arith.constant 8 : index
    %99 = memref.load %arg1[%c8] : memref<20xf32, #tpu.memory_space<smem>>
    %100 = vector.broadcast %99 : f32 to vector<8x128xf32>
    %101 = arith.mulf %0, %100 : vector<8x128xf32>
    %c8_26 = arith.constant 8 : index
    %102 = memref.load %arg2[%c8_26] : memref<20xf32, #tpu.memory_space<smem>>
    %103 = vector.broadcast %102 : f32 to vector<8x128xf32>
    %104 = arith.addf %101, %103 : vector<8x128xf32>
    %cst_27 = arith.constant 0.000000e+00 : f32
    %105 = vector.broadcast %cst_27 : f32 to vector<8x128xf32>
    %106 = arith.maximumf %104, %105 : vector<8x128xf32>
    %c8_28 = arith.constant 8 : index
    %107 = memref.load %arg3[%c8_28] : memref<20xf32, #tpu.memory_space<smem>>
    %108 = vector.broadcast %107 : f32 to vector<8x128xf32>
    %109 = arith.mulf %106, %108 : vector<8x128xf32>
    %110 = arith.addf %98, %109 : vector<8x128xf32>
    %c9 = arith.constant 9 : index
    %111 = memref.load %arg1[%c9] : memref<20xf32, #tpu.memory_space<smem>>
    %112 = vector.broadcast %111 : f32 to vector<8x128xf32>
    %113 = arith.mulf %0, %112 : vector<8x128xf32>
    %c9_29 = arith.constant 9 : index
    %114 = memref.load %arg2[%c9_29] : memref<20xf32, #tpu.memory_space<smem>>
    %115 = vector.broadcast %114 : f32 to vector<8x128xf32>
    %116 = arith.addf %113, %115 : vector<8x128xf32>
    %cst_30 = arith.constant 0.000000e+00 : f32
    %117 = vector.broadcast %cst_30 : f32 to vector<8x128xf32>
    %118 = arith.maximumf %116, %117 : vector<8x128xf32>
    %c9_31 = arith.constant 9 : index
    %119 = memref.load %arg3[%c9_31] : memref<20xf32, #tpu.memory_space<smem>>
    %120 = vector.broadcast %119 : f32 to vector<8x128xf32>
    %121 = arith.mulf %118, %120 : vector<8x128xf32>
    %122 = arith.addf %110, %121 : vector<8x128xf32>
    %c10 = arith.constant 10 : index
    %123 = memref.load %arg1[%c10] : memref<20xf32, #tpu.memory_space<smem>>
    %124 = vector.broadcast %123 : f32 to vector<8x128xf32>
    %125 = arith.mulf %0, %124 : vector<8x128xf32>
    %c10_32 = arith.constant 10 : index
    %126 = memref.load %arg2[%c10_32] : memref<20xf32, #tpu.memory_space<smem>>
    %127 = vector.broadcast %126 : f32 to vector<8x128xf32>
    %128 = arith.addf %125, %127 : vector<8x128xf32>
    %cst_33 = arith.constant 0.000000e+00 : f32
    %129 = vector.broadcast %cst_33 : f32 to vector<8x128xf32>
    %130 = arith.maximumf %128, %129 : vector<8x128xf32>
    %c10_34 = arith.constant 10 : index
    %131 = memref.load %arg3[%c10_34] : memref<20xf32, #tpu.memory_space<smem>>
    %132 = vector.broadcast %131 : f32 to vector<8x128xf32>
    %133 = arith.mulf %130, %132 : vector<8x128xf32>
    %134 = arith.addf %122, %133 : vector<8x128xf32>
    %c11 = arith.constant 11 : index
    %135 = memref.load %arg1[%c11] : memref<20xf32, #tpu.memory_space<smem>>
    %136 = vector.broadcast %135 : f32 to vector<8x128xf32>
    %137 = arith.mulf %0, %136 : vector<8x128xf32>
    %c11_35 = arith.constant 11 : index
    %138 = memref.load %arg2[%c11_35] : memref<20xf32, #tpu.memory_space<smem>>
    %139 = vector.broadcast %138 : f32 to vector<8x128xf32>
    %140 = arith.addf %137, %139 : vector<8x128xf32>
    %cst_36 = arith.constant 0.000000e+00 : f32
    %141 = vector.broadcast %cst_36 : f32 to vector<8x128xf32>
    %142 = arith.maximumf %140, %141 : vector<8x128xf32>
    %c11_37 = arith.constant 11 : index
    %143 = memref.load %arg3[%c11_37] : memref<20xf32, #tpu.memory_space<smem>>
    %144 = vector.broadcast %143 : f32 to vector<8x128xf32>
    %145 = arith.mulf %142, %144 : vector<8x128xf32>
    %146 = arith.addf %134, %145 : vector<8x128xf32>
    %c12 = arith.constant 12 : index
    %147 = memref.load %arg1[%c12] : memref<20xf32, #tpu.memory_space<smem>>
    %148 = vector.broadcast %147 : f32 to vector<8x128xf32>
    %149 = arith.mulf %0, %148 : vector<8x128xf32>
    %c12_38 = arith.constant 12 : index
    %150 = memref.load %arg2[%c12_38] : memref<20xf32, #tpu.memory_space<smem>>
    %151 = vector.broadcast %150 : f32 to vector<8x128xf32>
    %152 = arith.addf %149, %151 : vector<8x128xf32>
    %cst_39 = arith.constant 0.000000e+00 : f32
    %153 = vector.broadcast %cst_39 : f32 to vector<8x128xf32>
    %154 = arith.maximumf %152, %153 : vector<8x128xf32>
    %c12_40 = arith.constant 12 : index
    %155 = memref.load %arg3[%c12_40] : memref<20xf32, #tpu.memory_space<smem>>
    %156 = vector.broadcast %155 : f32 to vector<8x128xf32>
    %157 = arith.mulf %154, %156 : vector<8x128xf32>
    %158 = arith.addf %146, %157 : vector<8x128xf32>
    %c13 = arith.constant 13 : index
    %159 = memref.load %arg1[%c13] : memref<20xf32, #tpu.memory_space<smem>>
    %160 = vector.broadcast %159 : f32 to vector<8x128xf32>
    %161 = arith.mulf %0, %160 : vector<8x128xf32>
    %c13_41 = arith.constant 13 : index
    %162 = memref.load %arg2[%c13_41] : memref<20xf32, #tpu.memory_space<smem>>
    %163 = vector.broadcast %162 : f32 to vector<8x128xf32>
    %164 = arith.addf %161, %163 : vector<8x128xf32>
    %cst_42 = arith.constant 0.000000e+00 : f32
    %165 = vector.broadcast %cst_42 : f32 to vector<8x128xf32>
    %166 = arith.maximumf %164, %165 : vector<8x128xf32>
    %c13_43 = arith.constant 13 : index
    %167 = memref.load %arg3[%c13_43] : memref<20xf32, #tpu.memory_space<smem>>
    %168 = vector.broadcast %167 : f32 to vector<8x128xf32>
    %169 = arith.mulf %166, %168 : vector<8x128xf32>
    %170 = arith.addf %158, %169 : vector<8x128xf32>
    %c14 = arith.constant 14 : index
    %171 = memref.load %arg1[%c14] : memref<20xf32, #tpu.memory_space<smem>>
    %172 = vector.broadcast %171 : f32 to vector<8x128xf32>
    %173 = arith.mulf %0, %172 : vector<8x128xf32>
    %c14_44 = arith.constant 14 : index
    %174 = memref.load %arg2[%c14_44] : memref<20xf32, #tpu.memory_space<smem>>
    %175 = vector.broadcast %174 : f32 to vector<8x128xf32>
    %176 = arith.addf %173, %175 : vector<8x128xf32>
    %cst_45 = arith.constant 0.000000e+00 : f32
    %177 = vector.broadcast %cst_45 : f32 to vector<8x128xf32>
    %178 = arith.maximumf %176, %177 : vector<8x128xf32>
    %c14_46 = arith.constant 14 : index
    %179 = memref.load %arg3[%c14_46] : memref<20xf32, #tpu.memory_space<smem>>
    %180 = vector.broadcast %179 : f32 to vector<8x128xf32>
    %181 = arith.mulf %178, %180 : vector<8x128xf32>
    %182 = arith.addf %170, %181 : vector<8x128xf32>
    %c15 = arith.constant 15 : index
    %183 = memref.load %arg1[%c15] : memref<20xf32, #tpu.memory_space<smem>>
    %184 = vector.broadcast %183 : f32 to vector<8x128xf32>
    %185 = arith.mulf %0, %184 : vector<8x128xf32>
    %c15_47 = arith.constant 15 : index
    %186 = memref.load %arg2[%c15_47] : memref<20xf32, #tpu.memory_space<smem>>
    %187 = vector.broadcast %186 : f32 to vector<8x128xf32>
    %188 = arith.addf %185, %187 : vector<8x128xf32>
    %cst_48 = arith.constant 0.000000e+00 : f32
    %189 = vector.broadcast %cst_48 : f32 to vector<8x128xf32>
    %190 = arith.maximumf %188, %189 : vector<8x128xf32>
    %c15_49 = arith.constant 15 : index
    %191 = memref.load %arg3[%c15_49] : memref<20xf32, #tpu.memory_space<smem>>
    %192 = vector.broadcast %191 : f32 to vector<8x128xf32>
    %193 = arith.mulf %190, %192 : vector<8x128xf32>
    %194 = arith.addf %182, %193 : vector<8x128xf32>
    %c16 = arith.constant 16 : index
    %195 = memref.load %arg1[%c16] : memref<20xf32, #tpu.memory_space<smem>>
    %196 = vector.broadcast %195 : f32 to vector<8x128xf32>
    %197 = arith.mulf %0, %196 : vector<8x128xf32>
    %c16_50 = arith.constant 16 : index
    %198 = memref.load %arg2[%c16_50] : memref<20xf32, #tpu.memory_space<smem>>
    %199 = vector.broadcast %198 : f32 to vector<8x128xf32>
    %200 = arith.addf %197, %199 : vector<8x128xf32>
    %cst_51 = arith.constant 0.000000e+00 : f32
    %201 = vector.broadcast %cst_51 : f32 to vector<8x128xf32>
    %202 = arith.maximumf %200, %201 : vector<8x128xf32>
    %c16_52 = arith.constant 16 : index
    %203 = memref.load %arg3[%c16_52] : memref<20xf32, #tpu.memory_space<smem>>
    %204 = vector.broadcast %203 : f32 to vector<8x128xf32>
    %205 = arith.mulf %202, %204 : vector<8x128xf32>
    %206 = arith.addf %194, %205 : vector<8x128xf32>
    %c17 = arith.constant 17 : index
    %207 = memref.load %arg1[%c17] : memref<20xf32, #tpu.memory_space<smem>>
    %208 = vector.broadcast %207 : f32 to vector<8x128xf32>
    %209 = arith.mulf %0, %208 : vector<8x128xf32>
    %c17_53 = arith.constant 17 : index
    %210 = memref.load %arg2[%c17_53] : memref<20xf32, #tpu.memory_space<smem>>
    %211 = vector.broadcast %210 : f32 to vector<8x128xf32>
    %212 = arith.addf %209, %211 : vector<8x128xf32>
    %cst_54 = arith.constant 0.000000e+00 : f32
    %213 = vector.broadcast %cst_54 : f32 to vector<8x128xf32>
    %214 = arith.maximumf %212, %213 : vector<8x128xf32>
    %c17_55 = arith.constant 17 : index
    %215 = memref.load %arg3[%c17_55] : memref<20xf32, #tpu.memory_space<smem>>
    %216 = vector.broadcast %215 : f32 to vector<8x128xf32>
    %217 = arith.mulf %214, %216 : vector<8x128xf32>
    %218 = arith.addf %206, %217 : vector<8x128xf32>
    %c18 = arith.constant 18 : index
    %219 = memref.load %arg1[%c18] : memref<20xf32, #tpu.memory_space<smem>>
    %220 = vector.broadcast %219 : f32 to vector<8x128xf32>
    %221 = arith.mulf %0, %220 : vector<8x128xf32>
    %c18_56 = arith.constant 18 : index
    %222 = memref.load %arg2[%c18_56] : memref<20xf32, #tpu.memory_space<smem>>
    %223 = vector.broadcast %222 : f32 to vector<8x128xf32>
    %224 = arith.addf %221, %223 : vector<8x128xf32>
    %cst_57 = arith.constant 0.000000e+00 : f32
    %225 = vector.broadcast %cst_57 : f32 to vector<8x128xf32>
    %226 = arith.maximumf %224, %225 : vector<8x128xf32>
    %c18_58 = arith.constant 18 : index
    %227 = memref.load %arg3[%c18_58] : memref<20xf32, #tpu.memory_space<smem>>
    %228 = vector.broadcast %227 : f32 to vector<8x128xf32>
    %229 = arith.mulf %226, %228 : vector<8x128xf32>
    %230 = arith.addf %218, %229 : vector<8x128xf32>
    %c19 = arith.constant 19 : index
    %231 = memref.load %arg1[%c19] : memref<20xf32, #tpu.memory_space<smem>>
    %232 = vector.broadcast %231 : f32 to vector<8x128xf32>
    %233 = arith.mulf %0, %232 : vector<8x128xf32>
    %c19_59 = arith.constant 19 : index
    %234 = memref.load %arg2[%c19_59] : memref<20xf32, #tpu.memory_space<smem>>
    %235 = vector.broadcast %234 : f32 to vector<8x128xf32>
    %236 = arith.addf %233, %235 : vector<8x128xf32>
    %cst_60 = arith.constant 0.000000e+00 : f32
    %237 = vector.broadcast %cst_60 : f32 to vector<8x128xf32>
    %238 = arith.maximumf %236, %237 : vector<8x128xf32>
    %c19_61 = arith.constant 19 : index
    %239 = memref.load %arg3[%c19_61] : memref<20xf32, #tpu.memory_space<smem>>
    %240 = vector.broadcast %239 : f32 to vector<8x128xf32>
    %241 = arith.mulf %238, %240 : vector<8x128xf32>
    %242 = arith.addf %230, %241 : vector<8x128xf32>
    %c0_62 = arith.constant 0 : index
    %c0_63 = arith.constant 0 : index
    %243 = vector.load %arg6[%c0_62, %c0_63] : memref<8x128xf32, #tpu.memory_space<vmem>>, vector<8x128xf32>
    tpu.vector_store %arg6[%c0_62, %c0_63], %242 {strides = array<i32>} : memref<8x128xf32, #tpu.memory_space<vmem>>, vector<8x128xf32>,
    return
  }
  func.func @transform_0(%arg0: i32) -> i32 {
    %c0_i32 = arith.constant 0 : i32
    %c0_i32_0 = arith.constant 0 : i32
    return %c0_i32 : i32
  }
  func.func @transform_1(%arg0: i32) -> i32 {
    %c0_i32 = arith.constant 0 : i32
    %c0_i32_0 = arith.constant 0 : i32
    return %c0_i32 : i32
  }
  func.func @transform_2(%arg0: i32) -> i32 {
    %c0_i32 = arith.constant 0 : i32
    %c0_i32_0 = arith.constant 0 : i32
    return %c0_i32 : i32
  }
  func.func @transform_3(%arg0: i32) -> i32 {
    %c0_i32 = arith.constant 0 : i32
    %c0_i32_0 = arith.constant 0 : i32
    return %c0_i32 : i32
  }
  func.func @transform_4(%arg0: i32) -> (i32, i32) {
    %c0_i32 = arith.constant 0 : i32
    %c0_i32_0 = arith.constant 0 : i32
    return %arg0, %c0_i32 : i32, i32
  }
  func.func @transform_5(%arg0: i32) -> (i32, i32) {
    %c0_i32 = arith.constant 0 : i32
    %c0_i32_0 = arith.constant 0 : i32
    return %arg0, %c0_i32 : i32, i32
  }
}

</mosaic_0001>

<bundles_post_ra>
// kernel: tpu_custom_call.1
= control target key start
LH: loop header
LB: loop body
LE: loop exit
PB: predicated region body
PF: predicated region fallthrough
CT: control target
= control target key end

     0   :  { %11 = vsyncpa [#allocation5], 0  ;;  %s558_s0 = inlined_call_operand.vmem [shape: f32[20], index: 0, kind: input, shape index: {}]   ;;  %s559_s1 = inlined_call_operand.vmem [shape: f32[20], index: 1, kind: input, shape index: {}]   ;;  %s560_s2 = inlined_call_operand.vmem [shape: f32[20], index: 2, kind: input, shape index: {}]   ;;  %s561_s3 = inlined_call_operand.<no memory space> [shape: f32[1], index: 3, kind: input, shape index: {}]   ;;  %s562_s4 = inlined_call_operand.vmem [shape: f32[1,128], index: 4, kind: input, shape index: {}]   ;;  %s563_s5 = inlined_call_operand.hbm [shape: f32[1,128], index: 5, kind: output, shape index: {}]  }
   0x1   :  { %12 = vsyncpa [#allocation7], 0  ;;  %s28_s20 = sshll.u32 %s559_s1, 4  ;;  %s29_s20 = int_to_ptr.vmem [resolvable:$true] %s28_s20 }
   0x2   :  { %13 = vsyncpa [#allocation4], 0  ;;  %s19_s23 = sshll.u32 %s558_s0, 4  ;;  %s431_s24 = smov [#allocation6]   ;;  %s20_s23 = int_to_ptr.vmem [resolvable:$true] %s19_s23 }
   0x3   :  { %31 = dma.vmem_to_smem %s29_s20, 16, %s431_s24, [#allocation7]  }
   0x4   :  { %s432_s25 = smov [#allocation3]   ;;  %s37_s28 = sshll.u32 %s560_s2, 4  ;;  %s38_s28 = int_to_ptr.vmem [resolvable:$true] %s37_s28 }
   0x5   :  { %22 = dma.vmem_to_smem %s20_s23, 16, %s432_s25, [#allocation5]  }
   0x6   :  { %s433_s29 = smov [#allocation8]  }
   0x7   :  { %40 = dma.vmem_to_smem %s38_s28, 16, %s433_s29, [#allocation7]  }
   0x8   :  { %425 = dma.done.wait [#allocation5], 16  }
   0x9   :  { %426 = vsyncadd [#allocation5], 4294967280 }
   0xa   :  { %427 = dma.done.wait [#allocation7], 32  }
   0xb   :  { %428 = vsyncadd [#allocation7], 4294967264 }
   0xc   :  { %57 = sfence }
   0xd   :  { %s59_s1 = sld [smem:[#allocation3]]  ;;  %v479_v0 = vld [vmem:[%s562_s4] sm:$0xff]  ;;  %v70_v10 = vstv %s561_s3 }
   0xe   :  { %s62_s30 = sld [smem:[#allocation6]] }
   0xf   :  { %s66_s0 = sld [smem:[#allocation8]] }
  0x10   :  { %s302_s6 = sld [smem:[#allocation3 + $0x1]] }
  0x11   :  { %s303_s9 = sld [smem:[#allocation6 + $0x1]] }
  0x12   :  { %s481_s10 = sld [smem:[#allocation8 + $0x1]] }
  0x13   :  { %v60_v1 = vstv %s59_s1  ;;  %s305_s2 = sld [smem:[#allocation3 + $0x2]] }
  0x14   :  { %v61_v2 = vmul.f32 %v60_v1, %v479_v0  ;;  %v63_v3 = vstv %s62_s30  ;;  %s306_s11 = sld [smem:[#allocation6 + $0x2]] }
  0x15   :  { %s484_s12 = sld [smem:[#allocation8 + $0x2]]  ;;  %v67_v6 = vstv %s66_s0 }
  0x16   :  { %v64_v4 = vadd.f32 %v63_v3, %v61_v2  ;;  %v73_v5 = vstv %s302_s6  ;;  %s308_s13 = sld [smem:[#allocation3 + $0x3]] }
  0x17   :  { %v74_v7 = vmul.f32 %v73_v5, %v479_v0  ;;  %v76_v8 = vstv %s303_s9  ;;  %s309_s4 = sld [smem:[#allocation6 + $0x3]] }
  0x18   :  { %v65_v9 = vmax.f32 %v64_v4, 0.0  ;;  %s487_s14 = sld [smem:[#allocation8 + $0x3]]  ;;  %v80_v14 = vstv %s481_s10 }
  0x19   :  { %v77_v11 = vadd.f32 %v76_v8, %v74_v7  ;;  %v84_v12 = vstv %s305_s2  ;;  %s311_s17 = sld [smem:[#allocation3 + $0x4]] }
  0x1a   :  { %v68_v13 = vmul.f32 %v67_v6, %v65_v9  ;;  %v85_v15 = vmul.f32 %v84_v12, %v479_v0  ;;  %v87_v16 = vstv %s306_s11  ;;  %s312_s18 = sld [smem:[#allocation6 + $0x4]] }
  0x1b   :  { %v78_v17 = vmax.f32 %v77_v11, 0.0  ;;  %s494_s19 = sld [smem:[#allocation8 + $0x4]]  ;;  %v91_v22 = vstv %s484_s12 }
  0x1c   :  { %v71_v18 = vadd.f32 %v70_v10, %v68_v13  ;;  %v88_v19 = vadd.f32 %v87_v16, %v85_v15  ;;  %v95_v20 = vstv %s308_s13  ;;  %s314_s20 = sld [smem:[#allocation3 + $0x5]] }
  0x1d   :  { %v81_v21 = vmul.f32 %v80_v14, %v78_v17  ;;  %v96_v23 = vmul.f32 %v95_v20, %v479_v0  ;;  %v98_v24 = vstv %s309_s4  ;;  %s315_s3 = sld [smem:[#allocation6 + $0x5]] }
  0x1e   :  { %v89_v25 = vmax.f32 %v88_v19, 0.0  ;;  %s498_s21 = sld [smem:[#allocation8 + $0x5]]  ;;  %v102_v30 = vstv %s487_s14 }
  0x1f   :  { %v82_v26 = vadd.f32 %v81_v21, %v71_v18  ;;  %v99_v27 = vadd.f32 %v98_v24, %v96_v23  ;;  %v106_v28 = vstv %s311_s17  ;;  %s317_s22 = sld [smem:[#allocation3 + $0x6]] }
  0x20   :  { %v92_v29 = vmul.f32 %v91_v22, %v89_v25  ;;  %v107_v31 = vmul.f32 %v106_v28, %v479_v0  ;;  %v109_v32 = vstv %s312_s18  ;;  %s318_s23 = sld [smem:[#allocation6 + $0x6]] }
  0x21   :  { %v100_v33 = vmax.f32 %v99_v27, 0.0  ;;  %s502_s24 = sld [smem:[#allocation8 + $0x6]]  ;;  %v113_v38 = vstv %s494_s19 }
  0x22   :  { %v93_v34 = vadd.f32 %v92_v29, %v82_v26  ;;  %v110_v35 = vadd.f32 %v109_v32, %v107_v31  ;;  %v117_v36 = vstv %s314_s20  ;;  %s320_s25 = sld [smem:[#allocation3 + $0x7]] }
  0x23   :  { %v103_v37 = vmul.f32 %v102_v30, %v100_v33  ;;  %v118_v39 = vmul.f32 %v117_v36, %v479_v0  ;;  %v120_v40 = vstv %s315_s3  ;;  %s321_s26 = sld [smem:[#allocation6 + $0x7]] }
  0x24   :  { %v111_v41 = vmax.f32 %v110_v35, 0.0  ;;  %s506_s27 = sld [smem:[#allocation8 + $0x7]]  ;;  %v124_v46 = vstv %s498_s21 }
  0x25   :  { %v104_v42 = vadd.f32 %v103_v37, %v93_v34  ;;  %v121_v43 = vadd.f32 %v120_v40, %v118_v39  ;;  %v128_v44 = vstv %s317_s22  ;;  %s323_s28 = sld [smem:[#allocation3 + $0x8]] }
  0x26   :  { %v114_v45 = vmul.f32 %v113_v38, %v111_v41  ;;  %v129_v47 = vmul.f32 %v128_v44, %v479_v0  ;;  %v131_v48 = vstv %s318_s23  ;;  %s324_s29 = sld [smem:[#allocation6 + $0x8]] }
  0x27   :  { %v122_v49 = vmax.f32 %v121_v43, 0.0  ;;  %s510_s1 = sld [smem:[#allocation8 + $0x8]]  ;;  %v135_v54 = vstv %s502_s24 }
  0x28   :  { %v115_v50 = vadd.f32 %v114_v45, %v104_v42  ;;  %v132_v51 = vadd.f32 %v131_v48, %v129_v47  ;;  %v139_v52 = vstv %s320_s25  ;;  %s326_s30 = sld [smem:[#allocation3 + $0x9]] }
  0x29   :  { %v125_v53 = vmul.f32 %v124_v46, %v122_v49  ;;  %v140_v55 = vmul.f32 %v139_v52, %v479_v0  ;;  %v142_v56 = vstv %s321_s26  ;;  %s327_s0 = sld [smem:[#allocation6 + $0x9]] }
  0x2a   :  { %v133_v57 = vmax.f32 %v132_v51, 0.0  ;;  %s514_s6 = sld [smem:[#allocation8 + $0x9]]  ;;  %v146_v62 = vstv %s506_s27 }
  0x2b   :  { %v126_v58 = vadd.f32 %v125_v53, %v115_v50  ;;  %v143_v59 = vadd.f32 %v142_v56, %v140_v55  ;;  %v150_v60 = vstv %s323_s28  ;;  %s329_s7 = sld [smem:[#allocation3 + $0xa]] }
  0x2c   :  { %v136_v61 = vmul.f32 %v135_v54, %v133_v57  ;;  %v151_v63 = vmul.f32 %v150_v60, %v479_v0  ;;  %v153_v1 = vstv %s324_s29  ;;  %s330_s8 = sld [smem:[#allocation6 + $0xa]] }
  0x2d   :  { %v144_v2 = vmax.f32 %v143_v59, 0.0  ;;  %s518_s9 = sld [smem:[#allocation8 + $0xa]]  ;;  %v157_v7 = vstv %s510_s1 }
  0x2e   :  { %v137_v3 = vadd.f32 %v136_v61, %v126_v58  ;;  %v154_v4 = vadd.f32 %v153_v1, %v151_v63  ;;  %v161_v5 = vstv %s326_s30  ;;  %s332_s10 = sld [smem:[#allocation3 + $0xb]] }
  0x2f   :  { %v147_v6 = vmul.f32 %v146_v62, %v144_v2  ;;  %v162_v8 = vmul.f32 %v161_v5, %v479_v0  ;;  %v164_v9 = vstv %s327_s0  ;;  %s333_s2 = sld [smem:[#allocation6 + $0xb]] }
  0x30   :  { %v155_v10 = vmax.f32 %v154_v4, 0.0  ;;  %s522_s11 = sld [smem:[#allocation8 + $0xb]]  ;;  %v168_v15 = vstv %s514_s6 }
  0x31   :  { %v148_v11 = vadd.f32 %v147_v6, %v137_v3  ;;  %v165_v12 = vadd.f32 %v164_v9, %v162_v8  ;;  %v172_v13 = vstv %s329_s7  ;;  %s335_s12 = sld [smem:[#allocation3 + $0xc]] }
  0x32   :  { %v158_v14 = vmul.f32 %v157_v7, %v155_v10  ;;  %v173_v16 = vmul.f32 %v172_v13, %v479_v0  ;;  %v175_v17 = vstv %s330_s8  ;;  %s336_s13 = sld [smem:[#allocation6 + $0xc]] }
  0x33   :  { %v166_v18 = vmax.f32 %v165_v12, 0.0  ;;  %s526_s4 = sld [smem:[#allocation8 + $0xc]]  ;;  %v179_v23 = vstv %s518_s9 }
  0x34   :  { %v159_v19 = vadd.f32 %v158_v14, %v148_v11  ;;  %v176_v20 = vadd.f32 %v175_v17, %v173_v16  ;;  %v183_v21 = vstv %s332_s10  ;;  %s338_s14 = sld [smem:[#allocation3 + $0xd]] }
  0x35   :  { %v169_v22 = vmul.f32 %v168_v15, %v166_v18  ;;  %v184_v24 = vmul.f32 %v183_v21, %v479_v0  ;;  %v186_v25 = vstv %s333_s2  ;;  %s339_s15 = sld [smem:[#allocation6 + $0xd]] }
  0x36   :  { %v177_v26 = vmax.f32 %v176_v20, 0.0  ;;  %s530_s16 = sld [smem:[#allocation8 + $0xd]]  ;;  %v190_v31 = vstv %s522_s11 }
  0x37   :  { %v170_v27 = vadd.f32 %v169_v22, %v159_v19  ;;  %v187_v28 = vadd.f32 %v186_v25, %v184_v24  ;;  %v194_v29 = vstv %s335_s12  ;;  %s341_s17 = sld [smem:[#allocation3 + $0xe]] }
  0x38   :  { %v180_v30 = vmul.f32 %v179_v23, %v177_v26  ;;  %v195_v32 = vmul.f32 %v194_v29, %v479_v0  ;;  %v197_v33 = vstv %s336_s13  ;;  %s342_s18 = sld [smem:[#allocation6 + $0xe]] }
  0x39   :  { %v188_v34 = vmax.f32 %v187_v28, 0.0  ;;  %s534_s19 = sld [smem:[#allocation8 + $0xe]]  ;;  %v201_v39 = vstv %s526_s4 }
  0x3a   :  { %v181_v35 = vadd.f32 %v180_v30, %v170_v27  ;;  %v198_v36 = vadd.f32 %v197_v33, %v195_v32  ;;  %v205_v37 = vstv %s338_s14  ;;  %s344_s20 = sld [smem:[#allocation3 + $0xf]] }
  0x3b   :  { %v191_v38 = vmul.f32 %v190_v31, %v188_v34  ;;  %v206_v40 = vmul.f32 %v205_v37, %v479_v0  ;;  %v208_v41 = vstv %s339_s15  ;;  %s345_s3 = sld [smem:[#allocation6 + $0xf]] }
  0x3c   :  { %v199_v42 = vmax.f32 %v198_v36, 0.0  ;;  %s538_s21 = sld [smem:[#allocation8 + $0xf]]  ;;  %v212_v47 = vstv %s530_s16 }
  0x3d   :  { %v192_v43 = vadd.f32 %v191_v38, %v181_v35  ;;  %v209_v44 = vadd.f32 %v208_v41, %v206_v40  ;;  %v216_v45 = vstv %s341_s17  ;;  %s347_s22 = sld [smem:[#allocation3 + $0x10]] }
  0x3e   :  { %v202_v46 = vmul.f32 %v201_v39, %v199_v42  ;;  %v217_v48 = vmul.f32 %v216_v45, %v479_v0  ;;  %v219_v49 = vstv %s342_s18  ;;  %s348_s23 = sld [smem:[#allocation6 + $0x10]] }
  0x3f   :  { %v210_v50 = vmax.f32 %v209_v44, 0.0  ;;  %s542_s24 = sld [smem:[#allocation8 + $0x10]]  ;;  %v223_v55 = vstv %s534_s19 }
  0x40   :  { %v203_v51 = vadd.f32 %v202_v46, %v192_v43  ;;  %v220_v52 = vadd.f32 %v219_v49, %v217_v48  ;;  %v227_v53 = vstv %s344_s20  ;;  %s350_s25 = sld [smem:[#allocation3 + $0x11]] }
  0x41   :  { %v213_v54 = vmul.f32 %v212_v47, %v210_v50  ;;  %v228_v56 = vmul.f32 %v227_v53, %v479_v0  ;;  %v230_v57 = vstv %s345_s3  ;;  %s351_s26 = sld [smem:[#allocation6 + $0x11]] }
  0x42   :  { %v221_v58 = vmax.f32 %v220_v52, 0.0  ;;  %s546_s27 = sld [smem:[#allocation8 + $0x11]]  ;;  %v234_v63 = vstv %s538_s21 }
  0x43   :  { %v214_v59 = vadd.f32 %v213_v54, %v203_v51  ;;  %v231_v60 = vadd.f32 %v230_v57, %v228_v56  ;;  %v238_v61 = vstv %s347_s22  ;;  %s353_s28 = sld [smem:[#allocation3 + $0x12]] }
  0x44   :  { %v224_v62 = vmul.f32 %v223_v55, %v221_v58  ;;  %v239_v1 = vmul.f32 %v238_v61, %v479_v0  ;;  %v241_v2 = vstv %s348_s23  ;;  %s354_s29 = sld [smem:[#allocation6 + $0x12]] }
  0x45   :  { %v232_v3 = vmax.f32 %v231_v60, 0.0  ;;  %s355_s1 = sld [smem:[#allocation8 + $0x12]]  ;;  %v245_v8 = vstv %s542_s24 }
  0x46   :  { %v225_v4 = vadd.f32 %v224_v62, %v214_v59  ;;  %v242_v5 = vadd.f32 %v241_v2, %v239_v1  ;;  %v249_v6 = vstv %s350_s25  ;;  %s356_s30 = sld [smem:[#allocation3 + $0x13]] }
  0x47   :  { %v235_v7 = vmul.f32 %v234_v63, %v232_v3  ;;  %v250_v9 = vmul.f32 %v249_v6, %v479_v0  ;;  %v252_v10 = vstv %s351_s26  ;;  %s357_s0 = sld [smem:[#allocation6 + $0x13]] }
  0x48   :  { %v243_v11 = vmax.f32 %v242_v5, 0.0  ;;  %s358_s6 = sld [smem:[#allocation8 + $0x13]]  ;;  %v256_v16 = vstv %s546_s27 }
  0x49   :  { %v236_v12 = vadd.f32 %v235_v7, %v225_v4  ;;  %v253_v13 = vadd.f32 %v252_v10, %v250_v9  ;;  %v260_v14 = vstv %s353_s28 }
  0x4a   :  { %v246_v15 = vmul.f32 %v245_v8, %v243_v11  ;;  %v261_v17 = vmul.f32 %v260_v14, %v479_v0  ;;  %v263_v18 = vstv %s354_s29 }
  0x4b   :  { %v254_v19 = vmax.f32 %v253_v13, 0.0  ;;  %v267_v24 = vstv %s355_s1 }
  0x4c   :  { %v247_v20 = vadd.f32 %v246_v15, %v236_v12  ;;  %v264_v21 = vadd.f32 %v263_v18, %v261_v17  ;;  %v271_v22 = vstv %s356_s30 }
  0x4d   :  { %v257_v23 = vmul.f32 %v256_v16, %v254_v19  ;;  %v272_v25 = vmul.f32 %v271_v22, %v479_v0  ;;  %v274_v26 = vstv %s357_s0 }
  0x4e   :  { %v265_v27 = vmax.f32 %v264_v21, 0.0  ;;  %v278_v31 = vstv %s358_s6 }
  0x4f   :  { %v258_v28 = vadd.f32 %v257_v23, %v247_v20  ;;  %v275_v29 = vadd.f32 %v274_v26, %v272_v25 }
  0x50   :  { %v268_v30 = vmul.f32 %v267_v24, %v265_v27 }
  0x51   :  { %v276_v32 = vmax.f32 %v275_v29, 0.0 }
  0x52   :  { %v269_v33 = vadd.f32 %v268_v30, %v258_v28 }
  0x53   :  { %v279_v34 = vmul.f32 %v278_v31, %v276_v32 }
  0x55   :  { %v280_v35 = vadd.f32 %v279_v34, %v269_v33 }
  0x57   :  { %281 = vst [vmem:[#allocation9] sm:$0xff] %v280_v35 }
  0x58   :  { %285 = vsyncadd [#allocation4], 112  ;;  %s288_s9 = sshll.u32 %s563_s5, 4  ;;  %s434_s10 = smov [#allocation9]   ;;  %s289_s9 = int_to_ptr.hbm [resolvable:$true] %s288_s9 }
  0x59   :  { %s286_s2 = sshll.u32 %s434_s10, 4  ;;  %s435_s11 = smov 16   ;;  %s287_s2 = int_to_ptr.vmem [resolvable:$true] %s286_s2 }
  0x5a   :  { %s436_s12 = smov 1  }
  0x5b   :  { %294 = dma.vmem_to_hbm [thread:$0]  %s287_s2, 16, %s289_s9, [#allocation4], %s435_s11, %s435_s11, %s436_s12  }
  0x5c   :  { %429 = dma.done.wait [#allocation4], 128  }
  0x5d   :  { %430 = vsyncadd [#allocation4], 4294967168 }
  0x5e   :  { %299 = vsyncpa [#allocation4], 1 }
  0x5f   :  { %300 = vsyncpa [#allocation5], 1 }
  0x60   :  { %301 = vsyncpa [#allocation7], 1 }

</bundles_post_ra>
